<compile_context>
chip_gen: v5e
topology: v5e:2x2
jax: 0.10.0
libtpu: 0.0.40
codegen_flags: <defaults>
</compile_context>

<pallas_src>
import functools
import math

import jax
import jax.numpy as jnp
from jax import lax
from jax.experimental import pallas as pl
from jax.experimental.pallas import tpu as pltpu


def _fused_affinities_kernel(
    x_ref, t_ref, m_ref, aff_ref,          # inputs (logits, targets, mask, row flag)
    bce_out_ref, mse_out_ref,              # per-row-block partial sums
    bce_acc_ref, mse_acc_ref,              # small VMEM accumulators (<=8 x tile_s)
    *, rows, cols, tile_r, tile_s, fold_rows, mask_rows, mask_cols,
):
    i = pl.program_id(0)                   # row-block axis ("parallel")
    j = pl.program_id(1)                   # col-block axis ("arbitrary" reduction)

    @pl.when(j == 0)
    def _():
        bce_acc_ref[...] = jnp.zeros_like(bce_acc_ref)
        mse_acc_ref[...] = jnp.zeros_like(mse_acc_ref)

    # Native-dtype loads (bf16 / int8 / f32), cast to f32 in-register.
    x = x_ref[...].astype(jnp.float32)
    t = t_ref[...].astype(jnp.float32)
    m = m_ref[...].astype(jnp.float32)

    # Per-row channel classification (tiny per-row flag operand).
    aff_row = aff_ref[...] > 0.5                         # (tile_r, 1) bool

    # Ragged-edge bounds masks, built only when actually needed (static).
    valid = None
    if mask_rows:
        row = i * tile_r + lax.broadcasted_iota(jnp.int32, (tile_r, 1), 0)
        valid = row < rows
    if mask_cols:
        col = j * tile_s + lax.broadcasted_iota(jnp.int32, (1, tile_s), 1)
        cmask = col < cols
        valid = cmask if valid is None else (valid & cmask)

    if valid is None:
        aff_sel = aff_row
        lsd_sel = jnp.logical_not(aff_row)
    else:
        aff_sel = aff_row & valid
        lsd_sel = jnp.logical_not(aff_row) & valid

    # Shared transcendentals: one exp feeds both the numerically-stable
    # BCE-with-logits log-term and the sigmoid used by the MSE branch.
    e = jnp.exp(-jnp.abs(x))
    r = 1.0 / (1.0 + e)                                  # sigmoid(|x|), exact
    sig = jnp.where(x >= 0.0, r, e * r)                  # sigmoid(x)
    bce = jnp.maximum(x, 0.0) - x * t + jnp.log1p(e)
    d = sig - t
    mse = d * d

    # True selects: garbage in out-of-bounds lanes (incl. inf/nan) never
    # reaches the accumulators.  Do NOT replace with multiplicative masking.
    bce_blk = jnp.where(aff_sel, bce * m, 0.0)
    mse_blk = jnp.where(lsd_sel, mse * m, 0.0)

    # Fold sublane groups (pure VPU adds on layout-free static slices) so the
    # running accumulator is only (8, tile_s) instead of a full-tile RMW.
    if fold_rows:
        groups = tile_r // 8
        bfold = bce_blk[0:8]
        mfold = mse_blk[0:8]
        for g in range(1, groups):
            sl = slice(g * 8, (g + 1) * 8)
            bfold = bfold + bce_blk[sl]
            mfold = mfold + mse_blk[sl]
        bce_blk, mse_blk = bfold, mfold

    bce_acc_ref[...] += bce_blk
    mse_acc_ref[...] += mse_blk

    # One cross-lane reduction per row-block, in the epilogue.  The scalar
    # partial sum is broadcast into a lane-dense (1, 8, 128) output tile.
    @pl.when(j == pl.num_programs(1) - 1)
    def _():
        bce_out_ref[...] = jnp.full((1, 8, 128), jnp.sum(bce_acc_ref[...]), jnp.float32)
        mse_out_ref[...] = jnp.full((1, 8, 128), jnp.sum(mse_acc_ref[...]), jnp.float32)


def _round_up(a, b):
    return -(-a // b) * b


def _sublane_unit(*dtypes):
    """Native sublane packing of the narrowest input dtype (8/16/32 rows)."""
    pack = {1: 32, 2: 16, 4: 8, 8: 8}
    return max(pack.get(jnp.dtype(d).itemsize, 8) for d in dtypes)


def _default_tile_bytes():
    """Generation-aware per-input tile budget.

    v7x has only 64 MiB physical VMEM per TensorCore -> keep tiles <= 2 MiB;
    v5e/v6e (128 MiB physical) can afford 4 MiB tiles (the kernel is
    HBM-bound there, so fewer/bigger grid steps win)."""
    try:
        info = pltpu.get_tpu_info()
        if getattr(info, "vmem_capacity_bytes", 128 << 20) <= (64 << 20):
            return 2 << 20
        return 4 << 20
    except Exception:
        return 2 << 20


def _choose_tiles(rows, cols, max_tile_elems, unit):
    """Pick (tile_r, tile_s):
       * tile_s multiple of 128 (or == cols), preferring an exact divisor of
         cols so the column edge mask can be statically elided;
       * tile_r multiple of the sublane packing `unit` (or == rows);
       * tile_r * tile_s within the per-input element budget;
       * >= 2 row blocks whenever rows allow it (megacore / v7x)."""
    unit = max(8, int(unit))
    max_tile_elems = max(int(max_tile_elems), unit * 128)
    r_min = rows if rows < unit else unit

    # Lane (column) tile.
    if cols * max(r_min, 1) <= max_tile_elems:
        tile_s = cols
    else:
        budget_s = max(128, (max_tile_elems // max(r_min, 1)) // 128 * 128)
        tile_s = budget_s
        # Prefer a tile that divides cols exactly, as long as it costs at
        # most ~2x in tile size.
        for cand in range(budget_s, max(127, budget_s // 2 - 1), -128):
            if cols % cand == 0:
                tile_s = cand
                break

    # Sublane (row) tile.
    if rows <= unit:
        tile_r = rows
    else:
        r_budget = max(unit, (max_tile_elems // tile_s) // unit * unit)
        r_budget = min(r_budget, 1024)                 # bounds trace-time unroll
        half = _round_up(-(-rows // 2), unit)          # >= 2 row blocks
        tile_r = max(unit, min(r_budget, half))
    return tile_r, tile_s


@functools.partial(
    jax.jit,
    static_argnames=("lsds_weight", "affinities_weight", "nb_affinities",
                     "max_tile_bytes"),
)
def affinities_loss(
    output,
    target,
    mask,
    *,
    lsds_weight: float = 1.0,
    affinities_weight: float = 1.0,
    nb_affinities: int = 3,
    max_tile_bytes=None,            # None -> generation-aware default
):
    if output.shape != target.shape:
        raise ValueError(f"Output/target shape mismatch: {output.shape} vs {target.shape}")
    if mask.shape != output.shape:
        raise ValueError(f"Mask shape mismatch: {mask.shape} vs {output.shape}")
    if output.ndim < 2 or output.shape[1] < nb_affinities:
        raise ValueError(f"Expected at least {nb_affinities} affinity channels")

    n, c = output.shape[0], output.shape[1]
    cols = math.prod(output.shape[2:])
    rows = n * c

    # Zero-copy 2-D views of the contiguous tensors (no slice/cast/pad copies).
    x2 = output.reshape(rows, cols)
    t2 = target.reshape(rows, cols)
    m2 = mask.reshape(rows, cols)
    # Tiny per-row class flag (rows * 4 bytes of HBM).
    # TODO(synk): restructure to class-pure blocks (scalar prefetch + pl.when)
    # so only the needed loss is computed per block and this operand can go.
    aff_flag = ((jnp.arange(rows) % c) < nb_affinities).astype(jnp.float32)
    aff_flag = aff_flag.reshape(rows, 1)

    if max_tile_bytes is None:
        max_tile_bytes = _default_tile_bytes()
    unit = _sublane_unit(output.dtype, target.dtype, mask.dtype)
    tile_r, tile_s = _choose_tiles(rows, cols, max_tile_bytes // 4, unit)
    grid_r = pl.cdiv(rows, tile_r)
    grid_s = pl.cdiv(cols, tile_s)
    fold_rows = (tile_r > 8) and (tile_r % 8 == 0)
    acc_rows = 8 if fold_rows else tile_r
    mask_rows = (rows % tile_r) != 0
    mask_cols = (cols % tile_s) != 0

    kernel = functools.partial(
        _fused_affinities_kernel,
        rows=rows, cols=cols, tile_r=tile_r, tile_s=tile_s,
        fold_rows=fold_rows, mask_rows=mask_rows, mask_cols=mask_cols,
    )

    # Explicit scoped-VMEM request: 3 double-buffered input tiles + flag tile
    # + accumulators + output tiles, with headroom.  Fits v7x's 64 MiB and
    # lets v5e exceed its 16 MiB default scoped limit when tiles are large.
    itemsizes = [jnp.dtype(a.dtype).itemsize for a in (output, target, mask)]
    vmem_need = sum(2 * tile_r * tile_s * s for s in itemsizes)
    vmem_need += 2 * tile_r * 128 * 4            # lane-padded flag tile
    vmem_need += 2 * acc_rows * tile_s * 4       # accumulators
    vmem_need += 2 * 2 * 8 * 128 * 4             # double-buffered output tiles
    vmem_limit = min(max(vmem_need * 3 // 2 + (2 << 20), 16 << 20), 64 << 20)

    elems = rows * cols
    cost = pl.CostEstimate(
        flops=20 * elems,
        transcendentals=3 * elems,
        bytes_accessed=int(sum(elems * s for s in itemsizes)
                           + rows * 4 + 2 * grid_r * 8 * 128 * 4),
    )

    bce_part, mse_part = pl.pallas_call(
        kernel,
        out_shape=(
            jax.ShapeDtypeStruct((grid_r, 8, 128), jnp.float32),
            jax.ShapeDtypeStruct((grid_r, 8, 128), jnp.float32),
        ),
        grid_spec=pltpu.PrefetchScalarGridSpec(
            num_scalar_prefetch=0,
            grid=(grid_r, grid_s),
            in_specs=[
                pl.BlockSpec((tile_r, tile_s), lambda i, j: (i, j)),
                pl.BlockSpec((tile_r, tile_s), lambda i, j: (i, j)),
                pl.BlockSpec((tile_r, tile_s), lambda i, j: (i, j)),
                pl.BlockSpec((tile_r, 1), lambda i, j: (i, 0)),
            ],
            out_specs=(
                pl.BlockSpec((1, 8, 128), lambda i, j: (i, 0, 0)),
                pl.BlockSpec((1, 8, 128), lambda i, j: (i, 0, 0)),
            ),
            scratch_shapes=[
                pltpu.VMEM((acc_rows, tile_s), jnp.float32),
                pltpu.VMEM((acc_rows, tile_s), jnp.float32),
            ],
        ),
        compiler_params=pltpu.CompilerParams(
            dimension_semantics=("parallel", "arbitrary"),
            vmem_limit_bytes=int(vmem_limit),
        ),
        cost_estimate=cost,
    )(x2, t2, m2, aff_flag)

    # Combine per-row-block partial sums (each output tile is a broadcast of
    # its scalar partial sum, so one element per block suffices).
    bce_sum = jnp.sum(bce_part[:, 0, 0])
    mse_sum = jnp.sum(mse_part[:, 0, 0])

    # TODO(synk): the PyTorch module also print()s the two partial means; that
    # host-side debug side effect is not reproduced here.
    n_aff = n * nb_affinities * cols
    n_lsd = n * (c - nb_affinities) * cols
    loss = jnp.float32(0.0)
    if n_aff > 0:      # static guard: nb_affinities == 0 (PyTorch would NaN)
        loss = loss + jnp.float32(affinities_weight) * (bce_sum / jnp.float32(n_aff))
    if n_lsd > 0:      # static guard: nb_affinities == C (PyTorch would NaN)
        loss = loss + jnp.float32(lsds_weight) * (mse_sum / jnp.float32(n_lsd))
    return loss


def _reference(output, target, mask, lsds_weight, affinities_weight, nb_affinities):
    """Pure-JAX reference mirroring the PyTorch forward (f32 math)."""
    out = output.astype(jnp.float32)
    tgt = target.astype(jnp.float32)
    msk = mask.astype(jnp.float32)
    oa, ta, ma = out[:, :nb_affinities], tgt[:, :nb_affinities], msk[:, :nb_affinities]
    ol, tl, ml = out[:, nb_affinities:], tgt[:, nb_affinities:], msk[:, nb_affinities:]
    bce = (jnp.maximum(oa, 0.0) - oa * ta + jnp.log1p(jnp.exp(-jnp.abs(oa)))) * ma
    mse = jnp.square(jax.nn.sigmoid(ol) - tl) * ml
    return affinities_weight * bce.mean() + lsds_weight * mse.mean()


if __name__ == "__main__":
    key = jax.random.PRNGKey(0)

    def check(shape, nb_aff, dtype, mask_dtype, max_tile_bytes, tag, k):
        k_out, k_tgt, k_msk = jax.random.split(k, 3)
        output = jax.random.normal(k_out, shape, dtype=jnp.float32).astype(dtype)
        target = jax.random.uniform(k_tgt, shape, dtype=jnp.float32).astype(dtype)
        mask = (jax.random.uniform(k_msk, shape) > 0.3).astype(mask_dtype)
        got = affinities_loss(
            output, target, mask,
            lsds_weight=1.0, affinities_weight=1.0, nb_affinities=nb_aff,
            max_tile_bytes=max_tile_bytes,
        )
        got = jax.block_until_ready(got)
        want = _reference(output, target, mask, 1.0, 1.0, nb_aff)
        assert jnp.allclose(got, want, rtol=1e-5, atol=1e-5), (tag, got, want)

    k1, k2, k3 = jax.random.split(key, 3)
    # 1) Primary small NCHW case: batch=2, 8 channels (3 affinity + 5 LSDS), 16x16.
    #    (tiles divide exactly -> both edge masks statically elided; 2 row blocks.)
    check((2, 8, 16, 16), 3, jnp.float32, jnp.float32, None, "f32", k1)
    # 2) Native dtypes: bf16 logits/targets, int8 mask (cast happens in-kernel;
    #    exercises the 32-row sublane unit and the sublane-group fold path).
    check((2, 8, 16, 16), 3, jnp.bfloat16, jnp.int8, None, "bf16_int8", k2)
    # 3) Ragged 3-D case with a tiny tile budget to force multi-step
    #    accumulation and partial edge blocks on both grid axes.
    check((2, 5, 3, 5, 20), 3, jnp.float32, jnp.float32, 8 * 1024, "ragged", k3)

    print("KERNEL_OK")
</pallas_src>

<mosaic_0001>
module attributes {stable_mosaic.version = 11 : i64} {
  func.func @_fused_affinities_kernel(%arg0: i32, %arg1: i32, %arg2: memref<8x256xf32, #tpu.memory_space<vmem>>, %arg3: memref<8x256xf32, #tpu.memory_space<vmem>>, %arg4: memref<8x256xf32, #tpu.memory_space<vmem>>, %arg5: memref<8x1xf32, #tpu.memory_space<vmem>>, %arg6: memref<1x8x128xf32, #tpu.memory_space<vmem>>, %arg7: memref<1x8x128xf32, #tpu.memory_space<vmem>>, %arg8: memref<8x256xf32, #tpu.memory_space<vmem>>, %arg9: memref<8x256xf32, #tpu.memory_space<vmem>>) attributes {dimension_semantics = [#tpu.dimension_semantics<parallel>, #tpu.dimension_semantics<arbitrary>], iteration_bounds = array<i64: 2, 1>, scalar_prefetch = 0 : i64, scratch_operands = 2 : i64, tpu.core_type = #tpu.core_type<tc>, window_params = [{transform_indices = @transform_0, window_bounds = array<i64: 8, 256>}, {transform_indices = @transform_1, window_bounds = array<i64: 8, 256>}, {transform_indices = @transform_2, window_bounds = array<i64: 8, 256>}, {transform_indices = @transform_3, window_bounds = array<i64: 8, 1>}, {transform_indices = @transform_4, window_bounds = array<i64: 1, 8, 128>}, {transform_indices = @transform_5, window_bounds = array<i64: 1, 8, 128>}]} {
    %c0_i32 = arith.constant 0 : i32
    %0 = arith.cmpi eq, %arg1, %c0_i32 : i32
    %1 = arith.extui %0 : i1 to i32
    %c0_i32_0 = arith.constant 0 : i32
    %2 = arith.cmpi ne, %1, %c0_i32_0 : i32
    scf.if %2 {
      %cst_26 = arith.constant 0.000000e+00 : f32
      %49 = vector.broadcast %cst_26 : f32 to vector<8x256xf32>
      %c0_27 = arith.constant 0 : index
      %c0_28 = arith.constant 0 : index
      %50 = vector.load %arg8[%c0_27, %c0_28] : memref<8x256xf32, #tpu.memory_space<vmem>>, vector<8x256xf32>
      tpu.vector_store %arg8[%c0_27, %c0_28], %49 {strides = array<i32>} : memref<8x256xf32, #tpu.memory_space<vmem>>, vector<8x256xf32>,
      %cst_29 = arith.constant 0.000000e+00 : f32
      %51 = vector.broadcast %cst_29 : f32 to vector<8x256xf32>
      %c0_30 = arith.constant 0 : index
      %c0_31 = arith.constant 0 : index
      %52 = vector.load %arg9[%c0_30, %c0_31] : memref<8x256xf32, #tpu.memory_space<vmem>>, vector<8x256xf32>
      tpu.vector_store %arg9[%c0_30, %c0_31], %51 {strides = array<i32>} : memref<8x256xf32, #tpu.memory_space<vmem>>, vector<8x256xf32>,
    } else {
    }
    %c0 = arith.constant 0 : index
    %c0_1 = arith.constant 0 : index
    %3 = vector.load %arg2[%c0, %c0_1] : memref<8x256xf32, #tpu.memory_space<vmem>>, vector<8x256xf32>
    %c0_2 = arith.constant 0 : index
    %c0_3 = arith.constant 0 : index
    %4 = vector.load %arg3[%c0_2, %c0_3] : memref<8x256xf32, #tpu.memory_space<vmem>>, vector<8x256xf32>
    %c0_4 = arith.constant 0 : index
    %c0_5 = arith.constant 0 : index
    %5 = vector.load %arg4[%c0_4, %c0_5] : memref<8x256xf32, #tpu.memory_space<vmem>>, vector<8x256xf32>
    %c0_6 = arith.constant 0 : index
    %c0_7 = arith.constant 0 : index
    %6 = vector.load %arg5[%c0_6, %c0_7] : memref<8x1xf32, #tpu.memory_space<vmem>>, vector<8x1xf32>
    %cst = arith.constant 5.000000e-01 : f32
    %7 = vector.broadcast %cst : f32 to vector<8x1xf32>
    %8 = arith.cmpf ogt, %6, %7 : vector<8x1xf32>
    %cst_8 = arith.constant dense<true> : vector<8x1xi1>
    %9 = arith.xori %8, %cst_8 : vector<8x1xi1>
    %10 = math.absf %3 : vector<8x256xf32>
    %cst_9 = arith.constant 0.000000e+00 : f32
    %11 = vector.broadcast %cst_9 : f32 to vector<8x256xf32>
    %12 = arith.subf %11, %10 : vector<8x256xf32>
    %13 = math.exp %12 : vector<8x256xf32>
    %cst_10 = arith.constant 1.000000e+00 : f32
    %14 = vector.broadcast %cst_10 : f32 to vector<8x256xf32>
    %15 = arith.addf %14, %13 : vector<8x256xf32>
    %cst_11 = arith.constant 1.000000e+00 : f32
    %16 = vector.broadcast %cst_11 : f32 to vector<8x256xf32>
    %17 = arith.divf %16, %15 : vector<8x256xf32>
    %cst_12 = arith.constant 0.000000e+00 : f32
    %18 = vector.broadcast %cst_12 : f32 to vector<8x256xf32>
    %19 = arith.cmpf oge, %3, %18 : vector<8x256xf32>
    %20 = arith.mulf %13, %17 : vector<8x256xf32>
    %21 = arith.select %19, %17, %20 : vector<8x256xi1>, vector<8x256xf32>
    %cst_13 = arith.constant 0.000000e+00 : f32
    %22 = vector.broadcast %cst_13 : f32 to vector<8x256xf32>
    %23 = arith.maximumf %3, %22 : vector<8x256xf32>
    %24 = arith.mulf %3, %4 : vector<8x256xf32>
    %25 = arith.subf %23, %24 : vector<8x256xf32>
    %26 = math.log1p %13 : vector<8x256xf32>
    %27 = arith.addf %25, %26 : vector<8x256xf32>
    %28 = arith.subf %21, %4 : vector<8x256xf32>
    %29 = arith.mulf %28, %28 : vector<8x256xf32>
    %30 = arith.mulf %27, %5 : vector<8x256xf32>
    %cst_14 = arith.constant 0.000000e+00 : f32
    %31 = vector.shape_cast %8 : vector<8x1xi1> to vector<8x1xi1>
    %32 = vector.broadcast %31 : vector<8x1xi1> to vector<8x256xi1>
    %33 = vector.broadcast %cst_14 : f32 to vector<8x256xf32>
    %34 = arith.select %32, %30, %33 : vector<8x256xi1>, vector<8x256xf32>
    %35 = arith.mulf %29, %5 : vector<8x256xf32>
    %cst_15 = arith.constant 0.000000e+00 : f32
    %36 = vector.shape_cast %9 : vector<8x1xi1> to vector<8x1xi1>
    %37 = vector.broadcast %36 : vector<8x1xi1> to vector<8x256xi1>
    %38 = vector.broadcast %cst_15 : f32 to vector<8x256xf32>
    %39 = arith.select %37, %35, %38 : vector<8x256xi1>, vector<8x256xf32>
    %c0_16 = arith.constant 0 : index
    %c0_17 = arith.constant 0 : index
    %40 = vector.load %arg8[%c0_16, %c0_17] : memref<8x256xf32, #tpu.memory_space<vmem>>, vector<8x256xf32>
    %41 = arith.addf %40, %34 : vector<8x256xf32>
    %c0_18 = arith.constant 0 : index
    %c0_19 = arith.constant 0 : index
    %42 = vector.load %arg8[%c0_18, %c0_19] : memref<8x256xf32, #tpu.memory_space<vmem>>, vector<8x256xf32>
    tpu.vector_store %arg8[%c0_18, %c0_19], %41 {strides = array<i32>} : memref<8x256xf32, #tpu.memory_space<vmem>>, vector<8x256xf32>,
    %c0_20 = arith.constant 0 : index
    %c0_21 = arith.constant 0 : index
    %43 = vector.load %arg9[%c0_20, %c0_21] : memref<8x256xf32, #tpu.memory_space<vmem>>, vector<8x256xf32>
    %44 = arith.addf %43, %39 : vector<8x256xf32>
    %c0_22 = arith.constant 0 : index
    %c0_23 = arith.constant 0 : index
    %45 = vector.load %arg9[%c0_22, %c0_23] : memref<8x256xf32, #tpu.memory_space<vmem>>, vector<8x256xf32>
    tpu.vector_store %arg9[%c0_22, %c0_23], %44 {strides = array<i32>} : memref<8x256xf32, #tpu.memory_space<vmem>>, vector<8x256xf32>,
    %c0_i32_24 = arith.constant 0 : i32
    %46 = arith.cmpi eq, %arg1, %c0_i32_24 : i32
    %47 = arith.extui %46 : i1 to i32
    %c0_i32_25 = arith.constant 0 : i32
    %48 = arith.cmpi ne, %47, %c0_i32_25 : i32
    scf.if %48 {
      %c0_26 = arith.constant 0 : index
      %c0_27 = arith.constant 0 : index
      %49 = vector.load %arg8[%c0_26, %c0_27] : memref<8x256xf32, #tpu.memory_space<vmem>>, vector<8x256xf32>
      %50 = vector.shape_cast %49 : vector<8x256xf32> to vector<1x8x256xf32>
      %cst_28 = arith.constant dense<0.000000e+00> : vector<1xf32>
      %51 = vector.multi_reduction <add>, %50, %cst_28 [1, 2] : vector<1x8x256xf32> to vector<1xf32>
      %52 = vector.shape_cast %51 : vector<1xf32> to vector<1x1x1xf32>
      %53 = vector.extract %52[0, 0, 0] : f32 from vector<1x1x1xf32>
      %54 = vector.broadcast %53 : f32 to vector<1x8x128xf32>
      %c0_29 = arith.constant 0 : index
      %c0_30 = arith.constant 0 : index
      %c0_31 = arith.constant 0 : index
      %55 = vector.load %arg6[%c0_29, %c0_30, %c0_31] : memref<1x8x128xf32, #tpu.memory_space<vmem>>, vector<1x8x128xf32>
      tpu.vector_store %arg6[%c0_29, %c0_30, %c0_31], %54 {strides = array<i32>} : memref<1x8x128xf32, #tpu.memory_space<vmem>>, vector<1x8x128xf32>,
      %c0_32 = arith.constant 0 : index
      %c0_33 = arith.constant 0 : index
      %56 = vector.load %arg9[%c0_32, %c0_33] : memref<8x256xf32, #tpu.memory_space<vmem>>, vector<8x256xf32>
      %57 = vector.shape_cast %56 : vector<8x256xf32> to vector<1x8x256xf32>
      %cst_34 = arith.constant dense<0.000000e+00> : vector<1xf32>
      %58 = vector.multi_reduction <add>, %57, %cst_34 [1, 2] : vector<1x8x256xf32> to vector<1xf32>
      %59 = vector.shape_cast %58 : vector<1xf32> to vector<1x1x1xf32>
      %60 = vector.extract %59[0, 0, 0] : f32 from vector<1x1x1xf32>
      %61 = vector.broadcast %60 : f32 to vector<1x8x128xf32>
      %c0_35 = arith.constant 0 : index
      %c0_36 = arith.constant 0 : index
      %c0_37 = arith.constant 0 : index
      %62 = vector.load %arg7[%c0_35, %c0_36, %c0_37] : memref<1x8x128xf32, #tpu.memory_space<vmem>>, vector<1x8x128xf32>
      tpu.vector_store %arg7[%c0_35, %c0_36, %c0_37], %61 {strides = array<i32>} : memref<1x8x128xf32, #tpu.memory_space<vmem>>, vector<1x8x128xf32>,
    } else {
    }
    return
  }
  func.func @transform_0(%arg0: i32, %arg1: i32) -> (i32, i32) {
    %c0_i32 = arith.constant 0 : i32
    return %arg0, %arg1 : i32, i32
  }
  func.func @transform_1(%arg0: i32, %arg1: i32) -> (i32, i32) {
    %c0_i32 = arith.constant 0 : i32
    return %arg0, %arg1 : i32, i32
  }
  func.func @transform_2(%arg0: i32, %arg1: i32) -> (i32, i32) {
    %c0_i32 = arith.constant 0 : i32
    return %arg0, %arg1 : i32, i32
  }
  func.func @transform_3(%arg0: i32, %arg1: i32) -> (i32, i32) {
    %c0_i32 = arith.constant 0 : i32
    %c0_i32_0 = arith.constant 0 : i32
    return %arg0, %c0_i32 : i32, i32
  }
  func.func @transform_4(%arg0: i32, %arg1: i32) -> (i32, i32, i32) {
    %c0_i32 = arith.constant 0 : i32
    %c0_i32_0 = arith.constant 0 : i32
    %c0_i32_1 = arith.constant 0 : i32
    return %arg0, %c0_i32, %c0_i32_0 : i32, i32, i32
  }
  func.func @transform_5(%arg0: i32, %arg1: i32) -> (i32, i32, i32) {
    %c0_i32 = arith.constant 0 : i32
    %c0_i32_0 = arith.constant 0 : i32
    %c0_i32_1 = arith.constant 0 : i32
    return %arg0, %c0_i32, %c0_i32_0 : i32, i32, i32
  }
}

</mosaic_0001>

<bundles_post_ra>
// kernel: affinities_loss.1
= control target key start
LH: loop header
LB: loop body
LE: loop exit
PB: predicated region body
PF: predicated region fallthrough
CT: control target
= control target key end

     0   :  { %s769_s18 = smov 0   ;;  %s771_s19 = smov 0   ;;  %s848_s0 = inlined_call_operand.vmem [shape: f32[16,256], index: 0, kind: input, shape index: {}]   ;;  %s849_s1 = inlined_call_operand.vmem [shape: f32[16,256], index: 1, kind: input, shape index: {}]   ;;  %s850_s2 = inlined_call_operand.vmem [shape: f32[16,256], index: 2, kind: input, shape index: {}]   ;;  %s851_s3 = inlined_call_operand.vmem [shape: f32[16,1], index: 3, kind: input, shape index: {}]   ;;  %s852_s4 = inlined_call_operand.vmem [shape: f32[2,8,128], index: 4, kind: output, shape index: {0}]   ;;  %s853_s5 = inlined_call_operand.vmem [shape: f32[2,8,128], index: 5, kind: output, shape index: {1}]  }
   0x1   :  { %s773_s20 = smov 0  }
   0x2 LB: > { %s28_s21 = sadd.s32 1, %s731_s19  ;;  %p655_p0 = scmp.ge.s32.totalorder %s735_s20, 1  ;;  %s735_s20 = sphi %s773_s20, %s16_s20   ;;  %s731_s19 = sphi %s771_s19, %s859_s19   ;;  %s727_s18 = sphi %s769_s18, %s858_s18  }
   0x3   : > { %p30_p1 = scmp.ge.s32.totalorder %s28_s21, 2  ;;  %p252_p2 = scmp.lt.s32.totalorder %s735_s20, 3 }
   0x5   : > { %s861_s21 = smov (%p30_p1, %s28_s21), 0  ;;  %p253_p3 = pnand %p655_p0, %p252_p2 }
   0x6   : > { %p310_p4 = scmp.lt.s32.totalorder (!%p253_p3), %s727_s18, 1 }
   0x7   : > { %256 = sbr.rel (%p253_p3) target bundleno = 325 (0x145), region = 36 }
   0xc   : > { %v737_v0 = vmov 0   ;;  %s863_s18 = smov (!%p310_p4, %s727_s18), 1  ;;  %vm738_vm1 = vmmov 1  }
   0xd   : > { %700 = vset.pattern.permute.xlu0 %v737_v0  ;;  %s787_s22 = sshll.u32 %s863_s18, 3  ;;  %s793_s26 = sshll.u32 %s863_s18, 4 }
   0xe   : > { %s342_s25 = scalar_lea.vmem %s851_s3, %s787_s22  ;;  %s317_s29 = scalar_lea.vmem %s848_s0, %s793_s26 }
   0xf   : > { %v365_v1 = vld [vmem:[%s342_s25] sm:$0xff]  ;;  %v801_v5 = vld [vmem:[%s317_s29 + $0x8] sm:$0xff]  ;;  %s327_s7 = scalar_lea.vmem %s849_s1, %s793_s26  ;;  %s337_s10 = scalar_lea.vmem %s850_s2, %s793_s26 }
  0x10   : > { %vm366_vm0 = vcmp.gt.f32.partialorder %v365_v1, 0.5  ;;  %v799_v4 = vld [vmem:[%s317_s29] sm:$0xff]  ;;  %v369_v7 = vand.u32 2147483647, %v801_v5  ;;  %v362_v36 = vld [vmem:[%s327_s7 + $0x8] sm:$0xff]  ;;  %v415_v47 = vmax.f32 %v801_v5, 0.0  ;;  %s346_s13 = scalar_lea.vmem %s852_s4, %s787_s22  ;;  %s350_s17 = scalar_lea.vmem %s853_s5, %s787_s22 }
  0x11   : > { %v446_v2 = vsel %vm366_vm0, 1, %v737_v0  ;;  %vm367_vm2 = vmxor %vm366_vm0, %vm738_vm1  ;;  %v368_v6 = vand.u32 2147483647, %v799_v4  ;;  %v361_v35 = vld [vmem:[%s327_s7] sm:$0xff]  ;;  %v414_v46 = vmax.f32 %v799_v4, 0.0  ;;  %v417_v49 = vmul.f32 %v362_v36, %v801_v5  ;;  %v364_v1 = vld [vmem:[%s337_s10 + $0x8] sm:$0xff] }
  0x12   : > { %448 = vperm.xlu0 %700, %v446_v2   ;;  %v455_v3 = vsel %vm367_vm2, 1, %v737_v0  ;;  %v371_v9 = vsub.f32 0.0, %v369_v7  ;;  %v416_v48 = vmul.f32 %v361_v35, %v799_v4  ;;  %vm408_vm13 = vcmp.ge.f32.partialorder %v799_v4, 0.0  ;;  %v363_v0 = vld [vmem:[%s337_s10] sm:$0xff] }
  0x13   : > { %v370_v8 = vsub.f32 0.0, %v368_v6  ;;  %v419_v57 = vsub.f32 %v415_v47, %v417_v49  ;;  %vm409_vm14 = vcmp.ge.f32.partialorder %v801_v5, 0.0 }
  0x14   : > { %v374_v11 = vmul.f32 1.442695, %v371_v9  ;;  %v418_v56 = vsub.f32 %v414_v46, %v416_v48 }
  0x15   : > { %v372_v10 = vmul.f32 1.442695, %v370_v8 }
  0x17   : > { %701 = vpow2.f32 %v372_v10 }
  0x18   : > { %703 = vpow2.f32 %v374_v11 }
  0x1a   : > { %457 = vperm.xlu0 %700, %v455_v3  }
  0x1d   : > { %v702_v12 = vpop.eup %701 }
  0x1e   : > { %v704_v13 = vpop.eup %703  ;;  %v376_v14 = vadd.f32 1.0, %v702_v12  ;;  %v423_v24 = vmul.f32 -0.5, %v702_v12  ;;  %v426_v40 = vand.u32 2147483647, %v702_v12 }
  0x1f   : > { %v377_v15 = vadd.f32 1.0, %v704_v13  ;;  %v432_v25 = vmul.f32 -0.5, %v704_v13  ;;  %v435_v41 = vand.u32 2147483647, %v704_v13 }
  0x20   : > { %705 = vrcp.f32 %v376_v14  ;;  %vm383_vm3 = vweird.f32 %v376_v14  ;;  %v389_v26 = vand.u32 2147483648, %v376_v14  ;;  %v387_v30 = vand.u32 2147483647, %v376_v14 }
  0x21   : > { %707 = vrcp.f32 %v377_v15  ;;  %vm398_vm5 = vweird.f32 %v377_v15  ;;  %v404_v27 = vand.u32 2147483648, %v377_v15  ;;  %v402_v32 = vand.u32 2147483647, %v377_v15 }
  0x22   : > { %709 = vlog2.f32 %v376_v14  ;;  %v424_v37 = vadd.f32 1.0, %v423_v24  ;;  %v433_v38 = vadd.f32 1.0, %v432_v25  ;;  %v390_v42 = vor.u32 1.1754944e-38, %v389_v26 }
  0x23   : > { %711 = vlog2.f32 %v377_v15  ;;  %v405_v43 = vor.u32 1.1754944e-38, %v404_v27  ;;  %vm388_vm9 = vcmp.eq.f32.partialorder %v387_v30, 8.507059e+37  ;;  %vm403_vm10 = vcmp.eq.f32.partialorder %v402_v32, 8.507059e+37 }
  0x24   : > { %v425_v51 = vmul.f32 %v702_v12, %v424_v37  ;;  %v434_v53 = vmul.f32 %v704_v13, %v433_v38  ;;  %vm427_vm11 = vcmp.lt.f32.partialorder %v426_v40, 0.0004427343  ;;  %vm436_vm12 = vcmp.lt.f32.partialorder %v435_v41, 0.0004427343 }
  0x26   : > { %v706_v16 = vpop.eup %705 }
  0x27   : > { %v708_v17 = vpop.eup %707  ;;  %v379_v18 = vmul.f32 %v706_v16, %v376_v14  ;;  %vm384_vm4 = vweird.f32 %v706_v16 }
  0x28   : > { %v394_v19 = vmul.f32 %v708_v17, %v377_v15  ;;  %vm399_vm6 = vweird.f32 %v708_v17  ;;  %vm809_vm7 = vmor %vm383_vm3, %vm384_vm4  ;;  %v710_v34 = vpop.eup %709 }
  0x29   : > { %v380_v20 = vsub.f32 1.0, %v379_v18  ;;  %vm813_vm8 = vmor %vm398_vm5, %vm399_vm6  ;;  %v712_v39 = vpop.eup %711  ;;  %v422_v50 = vmul.f32 0.6931472, %v710_v34 }
  0x2a   : > { %v395_v21 = vsub.f32 1.0, %v394_v19  ;;  %v431_v52 = vmul.f32 0.6931472, %v712_v39 }
  0x2b   : > { %v381_v22 = vmul.f32 %v706_v16, %v380_v20  ;;  %v428_v58 = vsel %vm427_vm11, %v425_v51, %v422_v50 }
  0x2c   : > { %v396_v23 = vmul.f32 %v708_v17, %v395_v21  ;;  %v437_v59 = vsel %vm436_vm12, %v434_v53, %v431_v52  ;;  %v438_v62 = vadd.f32 %v428_v58, %v418_v56 }
  0x2d   : > { %v382_v28 = vadd.f32 %v706_v16, %v381_v22  ;;  %v439_v63 = vadd.f32 %v437_v59, %v419_v57 }
  0x2e   : > { %v397_v31 = vadd.f32 %v708_v17, %v396_v23  ;;  %v444_v6 = vmul.f32 %v438_v62, %v363_v0 }
  0x2f   : > { %v386_v44 = vsel %vm809_vm7, %v706_v16, %v382_v28  ;;  %v445_v7 = vmul.f32 %v439_v63, %v364_v1 }
  0x30   : > { %v401_v45 = vsel %vm813_vm8, %v708_v17, %v397_v31  ;;  %v391_v54 = vsel %vm388_vm9, %v390_v42, %v386_v44 }
  0x31   : > { %v406_v55 = vsel %vm403_vm10, %v405_v43, %v401_v45  ;;  %v410_v60 = vmul.f32 %v702_v12, %v391_v54 }
  0x32   : > { %v411_v61 = vmul.f32 %v704_v13, %v406_v55 }
  0x33   : > { %v412_v2 = vsel %vm408_vm13, %v391_v54, %v410_v60 }
  0x34   : > { %v413_v3 = vsel %vm409_vm14, %v406_v55, %v411_v61  ;;  %v440_v8 = vsub.f32 %v412_v2, %v361_v35 }
  0x35   : > { %v441_v9 = vsub.f32 %v413_v3, %v362_v36 }
  0x36   : > { %v442_v13 = vmul.f32 %v440_v8, %v440_v8 }
  0x37   : > { %v443_v14 = vmul.f32 %v441_v9, %v441_v9 }
  0x38   : > { %v453_v4 = vmul.f32 %v442_v13, %v363_v0 }
  0x39   : > { %v454_v5 = vmul.f32 %v443_v14, %v364_v1 }
  0x84   : > { %v449_v10 = vpop.permute.xlu0 %448 }
  0x85   : > { %vm450_vm15 = vcmp.eq.s32.totalorder %v449_v10, 1 }
  0x86   : > { %v451_v11 = vsel %vm450_vm15, %v444_v6, 0.0  ;;  %v452_v12 = vsel %vm450_vm15, %v445_v7, 0.0 }
  0x87   : > { %v479_v15 = vadd.f32 %v452_v12, %v451_v11 }
  0x89   : > { %480 = vadd.xlane.f32.xlu1 %v479_v15 }
  0x8c   : > { %v458_v16 = vpop.permute.xlu0 %457 }
  0x8d   : > { %vm459_vm0 = vcmp.eq.s32.totalorder %v458_v16, 1 }
  0x8e   : > { %v460_v17 = vsel %vm459_vm0, %v453_v4, 0.0  ;;  %v461_v18 = vsel %vm459_vm0, %v454_v5, 0.0 }
  0x8f   : > { %v493_v19 = vadd.f32 %v461_v18, %v460_v17 }
  0x91   : > { %494 = vadd.xlane.f32.xlu1 %v493_v19 }
  0xfc   : > { %v481_v20 = vpop.xlane.xlu1 %480 }
  0xfd   : > { %v482_v21 = vrot.slane %v481_v20, 4 }
  0xff   : > { %v483_v22 = vadd.f32 %v482_v21, %v481_v20 }
 0x101   : > { %v484_v23 = vrot.slane %v483_v22, 2 }
 0x103   : > { %v485_v24 = vadd.f32 %v484_v23, %v483_v22 }
 0x104   : > { %v495_v25 = vpop.xlane.xlu1 %494 }
 0x105   : > { %v496_v26 = vrot.slane %v495_v25, 4  ;;  %v486_v27 = vrot.slane %v485_v24, 1 }
 0x107   : > { %v497_v28 = vadd.f32 %v496_v26, %v495_v25  ;;  %v487_v29 = vadd.f32 %v486_v27, %v485_v24 }
 0x109   : > { %v498_v30 = vrot.slane %v497_v28, 2  ;;  %670 = vpush %v487_v29 }
 0x10b   : > { %v499_v31 = vadd.f32 %v498_v30, %v497_v28 }
 0x10d   : > { %v500_v32 = vrot.slane %v499_v31, 1 }
 0x10f   : > { %v501_v33 = vadd.f32 %v500_v32, %v499_v31 }
 0x111   : > { %672 = vpush %v501_v33 }
 0x13a   : > { %s671_s14 = spop %670 }
 0x13b   : > { %v489_v34 = vstv %s671_s14 }
 0x13c   : > { %490 = vst [vmem:[%s346_s13] sm:$0xff] %v489_v34 }
 0x142   : > { %s673_s18 = spop %672 }
 0x143   : > { %v503_v35 = vstv %s673_s18 }
 0x144   : > { %504 = vst [vmem:[%s350_s17] sm:$0xff] %v503_v35 }
 0x145 PF: > { %s16_s20 = sadd.s32 1, %s735_s20   ;;  %s858_s18 = smov %s731_s19 }
 0x146   : > { %p13_p5 = scmp.ge.s32.totalorder %s16_s20, 4   ;;  %s859_s19 = smov %s861_s21 }
 0x148   :  { %15 = sbr.rel (!%p13_p5) target bundleno = 2 (0x2), region = 95 }

</bundles_post_ra>
